<compile_context>
chip_gen: v5e
topology: v5e:2x2
jax: 0.10.0
libtpu: 0.0.40
codegen_flags: <defaults>
</compile_context>

<pallas_src>
import functools

import jax
import jax.numpy as jnp
from jax.experimental import pallas as pl
from jax.experimental.pallas import tpu as pltpu

LANE = 128
SUBLANE = 8
_VMEM_BUDGET = 40 * 1024 * 1024   # block-sizing budget, safe for v7x (64 MiB phys)


def _round_up(x, m):
    return (x + m - 1) // m * m


def _divisors_desc(n):
    return [d for d in range(n, 0, -1) if n % d == 0]


def _pick_block_b(B, max_block_b=128):
    """Largest divisor of B (<= max_block_b) giving nb >= 4, else nb >= 2."""
    divs = [d for d in _divisors_desc(B) if d <= max_block_b]
    for min_nb in (4, 2):
        for d in divs:
            if B // d >= min_nb:
                return d
    return B          # B == 1: nothing to shard


def _pick_hw_chunk(HW, block_b, KP, target_rows=2048):
    """Largest divisor of HW that is a multiple of 8 and keeps the
    double-buffered bf16 im2col block comfortably inside the VMEM budget."""
    cands = [d for d in _divisors_desc(HW) if d % SUBLANE == 0]
    if not cands:
        return HW
    for d in cands:
        rows = block_b * d
        if rows <= target_rows and 2 * rows * max(KP, LANE) * 2 <= _VMEM_BUDGET // 2:
            return d
    return cands[-1]


def _vmem_need_bytes(block_b, hw_chunk, KP, FP, HP, CP, single_buffer_consts):
    bf16, f32 = 2, 4
    xc = 2 * block_b * hw_chunk * max(KP, LANE) * bf16          # double-buffered input
    nbuf = 1 if single_buffer_consts else 2
    wts = nbuf * bf16 * (KP * FP + FP * HP + HP * FP + FP * CP)
    bia = nbuf * f32 * (2 * FP + HP + CP) * LANE // LANE
    outs = 2 * f32 * block_b * (CP + FP)                        # double-buffered outputs
    acc = f32 * block_b * FP
    return xc + wts + bia + outs + acc


# ----------------------------------------------------------------------------
# Fused kernel.  grid = (nb, nc): i = batch block ("parallel"),
# j = HW chunk ("arbitrary", reduction).  Per step: one MXU matmul
# (block_b*hw_chunk, KP) @ (KP, FP) + bias + ReLU, partial GAP accumulated into
# acc_ref.  On the last chunk the tiny projector / classifier matmuls run and
# the lane-dense (128-padded) outputs are stored.
# ----------------------------------------------------------------------------
def _fused_kernel(xc_ref, wc_ref, bc_ref, w1_ref, b1_ref, w2_ref, b2_ref,
                  wfc_ref, bfc_ref, pred_ref, proj_ref, acc_ref,
                  *, block_b, hw_chunk, inv_hw):
    j = pl.program_id(1)

    @pl.when(j == 0)
    def _init():
        acc_ref[...] = jnp.zeros_like(acc_ref)

    # conv3x3 (im2col) + bias + ReLU for this chunk, f32 accumulation on MXU.
    kp = xc_ref.shape[-1]
    xc = xc_ref[...].reshape(block_b * hw_chunk, kp)              # bf16, layout-preserving
    z = jnp.dot(xc, wc_ref[...], preferred_element_type=jnp.float32)
    z = jnp.maximum(z + bc_ref[...], 0.0)                         # (M, FP) f32

    # partial global-average-pool: per-image sums for this chunk.
    acc_ref[...] += z.reshape(block_b, hw_chunk, z.shape[-1]).sum(axis=1)

    @pl.when(j == pl.num_programs(1) - 1)
    def _epilogue():
        feat = acc_ref[...] * inv_hw                              # (block_b, FP) f32
        # projector: Linear -> ReLU -> Linear, residual add (bf16 MXU, f32 acc)
        h = jnp.dot(feat.astype(jnp.bfloat16), w1_ref[...],
                    preferred_element_type=jnp.float32) + b1_ref[...]
        h = jnp.maximum(h, 0.0)
        proj = feat + jnp.dot(h.astype(jnp.bfloat16), w2_ref[...],
                              preferred_element_type=jnp.float32) + b2_ref[...]
        pred = jnp.dot(proj.astype(jnp.bfloat16), wfc_ref[...],
                       preferred_element_type=jnp.float32) + bfc_ref[...]
        proj_ref[0] = proj.astype(proj_ref.dtype)
        pred_ref[0] = pred.astype(pred_ref.dtype)


# ----------------------------------------------------------------------------
# Wrapper: layout glue (im2col pre-stack, bf16 cast, lane padding) + one
# pallas_call.
# ----------------------------------------------------------------------------
def projection_classifier_forward(x_nchw, params, block_b=None, hw_chunk=None):
    B, Cin, H, W = x_nchw.shape
    F = params["w_conv"].shape[-1]
    HID = params["w1"].shape[1]
    C = params["wfc"].shape[1]
    K = 9 * Cin
    HW = H * W
    FP, HP, CP = (_round_up(d, LANE) for d in (F, HID, C))
    # Lane-pad the contraction dim only when big enough to pay off.
    KP = _round_up(K, LANE) if K >= 2 * LANE else K

    if block_b is None:
        block_b = _pick_block_b(B)
    assert B % block_b == 0
    nb = B // block_b

    if hw_chunk is None:
        hw_chunk = _pick_hw_chunk(HW, block_b, KP)
    assert HW % hw_chunk == 0
    assert hw_chunk % SUBLANE == 0 or hw_chunk == HW
    nc = HW // hw_chunk

    # --- glue (wrapper/XLA): NCHW -> NHWC, zero pad=1, im2col, cast bf16 ---
    x_nhwc = jnp.transpose(x_nchw, (0, 2, 3, 1)).astype(jnp.bfloat16)
    xp = jnp.pad(x_nhwc, ((0, 0), (1, 1), (1, 1), (0, 0)))
    cols = [xp[:, kh:kh + H, kw:kw + W, :] for kh in range(3) for kw in range(3)]
    x_cols = jnp.concatenate(cols, axis=-1).reshape(B, HW, K)
    if KP > K:
        x_cols = jnp.pad(x_cols, ((0, 0), (0, 0), (0, KP - K)))

    # --- lane-pad params: GEMM weights in bf16, biases in f32 (padded cols 0) ---
    def pad2(a, rows, cols_):
        return jnp.pad(a, ((0, rows - a.shape[0]), (0, cols_ - a.shape[1])))

    wc = pad2(params["w_conv"].reshape(K, F), KP, FP).astype(jnp.bfloat16)
    w1 = pad2(params["w1"], FP, HP).astype(jnp.bfloat16)
    w2 = pad2(params["w2"], HP, FP).astype(jnp.bfloat16)
    wfc = pad2(params["wfc"], FP, CP).astype(jnp.bfloat16)
    bc = pad2(params["b_conv"].reshape(1, F).astype(jnp.float32), 1, FP)
    b1 = pad2(params["b1"].reshape(1, HID).astype(jnp.float32), 1, HP)
    b2 = pad2(params["b2"].reshape(1, F).astype(jnp.float32), 1, FP)
    bfc = pad2(params["bfc"].reshape(1, C).astype(jnp.float32), 1, CP)

    kernel = functools.partial(_fused_kernel, block_b=block_b,
                               hw_chunk=hw_chunk, inv_hw=1.0 / HW)

    def run(single_buffer_consts):
        def const(shape):
            idx = lambda i, j, _s=shape: (0,) * len(_s)
            if single_buffer_consts:
                # constant index_map -> one resident buffer is enough (saves
                # a full extra copy of every weight in VMEM; key on v7x).
                return pl.BlockSpec(shape, idx, pipeline_mode=pl.Buffered(buffer_count=1))
            return pl.BlockSpec(shape, idx)

        need = _vmem_need_bytes(block_b, hw_chunk, KP, FP, HP, CP,
                                single_buffer_consts)
        vmem_limit = int(min(48 * 1024 * 1024, max(2 * need, 32 * 1024 * 1024)))

        return pl.pallas_call(
            kernel,
            out_shape=(jax.ShapeDtypeStruct((nb, block_b, CP), jnp.float32),
                       jax.ShapeDtypeStruct((nb, block_b, FP), jnp.float32)),
            grid=(nb, nc),
            in_specs=[
                pl.BlockSpec((block_b, hw_chunk, KP), lambda i, j: (i, j, 0)),
                const((KP, FP)), const((1, FP)),        # conv w, b
                const((FP, HP)), const((1, HP)),        # proj w1, b1
                const((HP, FP)), const((1, FP)),        # proj w2, b2
                const((FP, CP)), const((1, CP)),        # fc  w, b
            ],
            out_specs=(pl.BlockSpec((1, block_b, CP), lambda i, j: (i, 0, 0)),
                       pl.BlockSpec((1, block_b, FP), lambda i, j: (i, 0, 0))),
            scratch_shapes=[pltpu.VMEM((block_b, FP), jnp.float32)],
            compiler_params=pltpu.CompilerParams(
                dimension_semantics=("parallel", "arbitrary"),
                vmem_limit_bytes=vmem_limit),
        )(x_cols, wc, bc, w1, b1, w2, b2, wfc, bfc)

    try:
        pred_p, proj_p = run(single_buffer_consts=True)
    except Exception:
        # Fallback for JAX versions without BlockSpec(pipeline_mode=...) /
        # single-buffering support; everything else is identical.
        pred_p, proj_p = run(single_buffer_consts=False)

    pred = pred_p.reshape(B, CP)[:, :C]
    proj = proj_p.reshape(B, FP)[:, :F]
    return pred, proj


# ----------------------------------------------------------------------------
# Params + plain-JAX (f32) reference
# ----------------------------------------------------------------------------
def init_params(key, cin, feat_dim, hid_dim, num_classes):
    ks = jax.random.split(key, 7)
    s = 0.05
    # weights stored as (in, out); equivalent to PyTorch Linear weight.T
    return {
        "w_conv": s * jax.random.normal(ks[0], (3, 3, cin, feat_dim), jnp.float32),
        "b_conv": s * jax.random.normal(ks[1], (feat_dim,), jnp.float32),
        "w1": s * jax.random.normal(ks[2], (feat_dim, hid_dim), jnp.float32),
        "b1": s * jax.random.normal(ks[3], (hid_dim,), jnp.float32),
        "w2": s * jax.random.normal(ks[4], (hid_dim, feat_dim), jnp.float32),
        "b2": s * jax.random.normal(ks[5], (feat_dim,), jnp.float32),
        "wfc": s * jax.random.normal(ks[6], (feat_dim, num_classes), jnp.float32),
        "bfc": jnp.zeros((num_classes,), jnp.float32),
    }


def _reference_forward(x_nchw, p):
    x = jnp.transpose(x_nchw, (0, 2, 3, 1))
    xp = jnp.pad(x, ((0, 0), (1, 1), (1, 1), (0, 0)))
    B, _, H, W = x_nchw.shape
    F = p["w_conv"].shape[-1]
    out = jnp.zeros((B, H, W, F), jnp.float32)
    for kh in range(3):
        for kw in range(3):
            out = out + jnp.einsum("bhwc,cf->bhwf",
                                   xp[:, kh:kh + H, kw:kw + W, :],
                                   p["w_conv"][kh, kw])
    feat = jnp.mean(jnp.maximum(out + p["b_conv"], 0.0), axis=(1, 2))
    h = jnp.maximum(feat @ p["w1"] + p["b1"], 0.0)
    proj = feat + h @ p["w2"] + p["b2"]
    pred = proj @ p["wfc"] + p["bfc"]
    return pred, proj


if __name__ == "__main__":
    B, Cin, H, W = 2, 4, 16, 16
    FEAT, HID, NUM_CLASSES = 32, 32, 10

    key = jax.random.PRNGKey(0)
    kx, kp = jax.random.split(key)
    x = jax.random.normal(kx, (B, Cin, H, W), jnp.float32)
    params = init_params(kp, Cin, FEAT, HID, NUM_CLASSES)

    # hw_chunk=64 -> 4 reduction chunks per batch block (exercises the
    # accumulate + pl.when epilogue path); block_b defaults to 1 so nb = 2 and
    # the "parallel" batch axis has more than one step.
    pred, proj = projection_classifier_forward(x, params, hw_chunk=64)
    jax.block_until_ready((pred, proj))

    pred_ref, proj_ref = _reference_forward(x, params)
    assert pred.shape == (B, NUM_CLASSES) and proj.shape == (B, FEAT)
    # bf16 GEMM operands (per perf review) -> compare to the f32 reference with
    # a correspondingly looser tolerance (observed error is ~1e-3).
    assert jnp.allclose(pred, pred_ref, atol=2e-2, rtol=2e-2), \
        float(jnp.max(jnp.abs(pred - pred_ref)))
    assert jnp.allclose(proj, proj_ref, atol=2e-2, rtol=2e-2), \
        float(jnp.max(jnp.abs(proj - proj_ref)))

    print("KERNEL_OK")
</pallas_src>

<mosaic_0001>
module attributes {stable_mosaic.version = 11 : i64} {
  func.func @_fused_kernel(%arg0: i32, %arg1: i32, %arg2: memref<1x64x36xbf16, #tpu.memory_space<vmem>>, %arg3: memref<36x128xbf16, #tpu.memory_space<vmem>>, %arg4: memref<1x128xf32, #tpu.memory_space<vmem>>, %arg5: memref<128x128xbf16, #tpu.memory_space<vmem>>, %arg6: memref<1x128xf32, #tpu.memory_space<vmem>>, %arg7: memref<128x128xbf16, #tpu.memory_space<vmem>>, %arg8: memref<1x128xf32, #tpu.memory_space<vmem>>, %arg9: memref<128x128xbf16, #tpu.memory_space<vmem>>, %arg10: memref<1x128xf32, #tpu.memory_space<vmem>>, %arg11: memref<1x1x128xf32, #tpu.memory_space<vmem>>, %arg12: memref<1x1x128xf32, #tpu.memory_space<vmem>>, %arg13: memref<1x128xf32, #tpu.memory_space<vmem>>) attributes {dimension_semantics = [#tpu.dimension_semantics<parallel>, #tpu.dimension_semantics<arbitrary>], iteration_bounds = array<i64: 2, 4>, scalar_prefetch = 0 : i64, scratch_operands = 1 : i64, tpu.core_type = #tpu.core_type<tc>, window_params = [{transform_indices = @transform_0, window_bounds = array<i64: 1, 64, 36>}, {pipeline_mode = #tpu.pipeline_mode<synchronous>, transform_indices = @transform_1, window_bounds = array<i64: 36, 128>}, {pipeline_mode = #tpu.pipeline_mode<synchronous>, transform_indices = @transform_2, window_bounds = array<i64: 1, 128>}, {pipeline_mode = #tpu.pipeline_mode<synchronous>, transform_indices = @transform_3, window_bounds = array<i64: 128, 128>}, {pipeline_mode = #tpu.pipeline_mode<synchronous>, transform_indices = @transform_4, window_bounds = array<i64: 1, 128>}, {pipeline_mode = #tpu.pipeline_mode<synchronous>, transform_indices = @transform_5, window_bounds = array<i64: 128, 128>}, {pipeline_mode = #tpu.pipeline_mode<synchronous>, transform_indices = @transform_6, window_bounds = array<i64: 1, 128>}, {pipeline_mode = #tpu.pipeline_mode<synchronous>, transform_indices = @transform_7, window_bounds = array<i64: 128, 128>}, {pipeline_mode = #tpu.pipeline_mode<synchronous>, transform_indices = @transform_8, window_bounds = array<i64: 1, 128>}, {transform_indices = @transform_9, window_bounds = array<i64: 1, 1, 128>}, {transform_indices = @transform_10, window_bounds = array<i64: 1, 1, 128>}]} {
    %c0_i32 = arith.constant 0 : i32
    %0 = arith.cmpi eq, %arg1, %c0_i32 : i32
    %1 = arith.extui %0 : i1 to i32
    %c0_i32_0 = arith.constant 0 : i32
    %2 = arith.cmpi ne, %1, %c0_i32_0 : i32
    scf.if %2 {
      %cst_14 = arith.constant 0.000000e+00 : f32
      %20 = vector.broadcast %cst_14 : f32 to vector<1x128xf32>
      %c0_15 = arith.constant 0 : index
      %c0_16 = arith.constant 0 : index
      %21 = vector.load %arg13[%c0_15, %c0_16] : memref<1x128xf32, #tpu.memory_space<vmem>>, vector<1x128xf32>
      tpu.vector_store %arg13[%c0_15, %c0_16], %20 {strides = array<i32>} : memref<1x128xf32, #tpu.memory_space<vmem>>, vector<1x128xf32>,
    } else {
    }
    %c0 = arith.constant 0 : index
    %c0_1 = arith.constant 0 : index
    %c0_2 = arith.constant 0 : index
    %3 = vector.load %arg2[%c0, %c0_1, %c0_2] : memref<1x64x36xbf16, #tpu.memory_space<vmem>>, vector<1x64x36xbf16>
    %4 = vector.shape_cast %3 : vector<1x64x36xbf16> to vector<64x36xbf16>
    %c0_3 = arith.constant 0 : index
    %c0_4 = arith.constant 0 : index
    %5 = vector.load %arg3[%c0_3, %c0_4] : memref<36x128xbf16, #tpu.memory_space<vmem>>, vector<36x128xbf16>
    %cst = arith.constant dense<0.000000e+00> : vector<64x128xf32>
    %6 = tpu.matmul %4, %5, %cst {dimension_numbers = #tpu.dot_dimension_numbers<[1], [0], [0], [1], [0, 0, 1, 1], [], []>} : vector<64x36xbf16>, vector<36x128xbf16>, vector<64x128xf32> -> vector<64x128xf32>
    %c0_5 = arith.constant 0 : index
    %c0_6 = arith.constant 0 : index
    %7 = vector.load %arg4[%c0_5, %c0_6] : memref<1x128xf32, #tpu.memory_space<vmem>>, vector<1x128xf32>
    %8 = vector.broadcast %7 : vector<1x128xf32> to vector<64x128xf32>
    %9 = arith.addf %6, %8 : vector<64x128xf32>
    %cst_7 = arith.constant 0.000000e+00 : f32
    %10 = vector.broadcast %cst_7 : f32 to vector<64x128xf32>
    %11 = arith.maximumf %9, %10 : vector<64x128xf32>
    %c0_8 = arith.constant 0 : index
    %c0_9 = arith.constant 0 : index
    %12 = vector.load %arg13[%c0_8, %c0_9] : memref<1x128xf32, #tpu.memory_space<vmem>>, vector<1x128xf32>
    %13 = vector.shape_cast %11 : vector<64x128xf32> to vector<1x64x128xf32>
    %cst_10 = arith.constant dense<0.000000e+00> : vector<1x128xf32>
    %14 = vector.multi_reduction <add>, %13, %cst_10 [1] : vector<1x64x128xf32> to vector<1x128xf32>
    %15 = arith.addf %12, %14 : vector<1x128xf32>
    %c0_11 = arith.constant 0 : index
    %c0_12 = arith.constant 0 : index
    %16 = vector.load %arg13[%c0_11, %c0_12] : memref<1x128xf32, #tpu.memory_space<vmem>>, vector<1x128xf32>
    tpu.vector_store %arg13[%c0_11, %c0_12], %15 {strides = array<i32>} : memref<1x128xf32, #tpu.memory_space<vmem>>, vector<1x128xf32>,
    %c3_i32 = arith.constant 3 : i32
    %17 = arith.cmpi eq, %arg1, %c3_i32 : i32
    %18 = arith.extui %17 : i1 to i32
    %c0_i32_13 = arith.constant 0 : i32
    %19 = arith.cmpi ne, %18, %c0_i32_13 : i32
    scf.if %19 {
      %c0_14 = arith.constant 0 : index
      %c0_15 = arith.constant 0 : index
      %20 = vector.load %arg13[%c0_14, %c0_15] : memref<1x128xf32, #tpu.memory_space<vmem>>, vector<1x128xf32>
      %cst_16 = arith.constant 3.906250e-03 : f32
      %21 = vector.broadcast %cst_16 : f32 to vector<1x128xf32>
      %22 = arith.mulf %20, %21 : vector<1x128xf32>
      %23 = arith.truncf %22 : vector<1x128xf32> to vector<1x128xbf16>
      %c0_17 = arith.constant 0 : index
      %c0_18 = arith.constant 0 : index
      %24 = vector.load %arg5[%c0_17, %c0_18] : memref<128x128xbf16, #tpu.memory_space<vmem>>, vector<128x128xbf16>
      %cst_19 = arith.constant dense<0.000000e+00> : vector<1x128xf32>
      %25 = tpu.matmul %23, %24, %cst_19 {dimension_numbers = #tpu.dot_dimension_numbers<[1], [0], [0], [1], [0, 0, 1, 1], [], []>} : vector<1x128xbf16>, vector<128x128xbf16>, vector<1x128xf32> -> vector<1x128xf32>
      %c0_20 = arith.constant 0 : index
      %c0_21 = arith.constant 0 : index
      %26 = vector.load %arg6[%c0_20, %c0_21] : memref<1x128xf32, #tpu.memory_space<vmem>>, vector<1x128xf32>
      %27 = arith.addf %25, %26 : vector<1x128xf32>
      %cst_22 = arith.constant 0.000000e+00 : f32
      %28 = vector.broadcast %cst_22 : f32 to vector<1x128xf32>
      %29 = arith.maximumf %27, %28 : vector<1x128xf32>
      %30 = arith.truncf %29 : vector<1x128xf32> to vector<1x128xbf16>
      %c0_23 = arith.constant 0 : index
      %c0_24 = arith.constant 0 : index
      %31 = vector.load %arg7[%c0_23, %c0_24] : memref<128x128xbf16, #tpu.memory_space<vmem>>, vector<128x128xbf16>
      %cst_25 = arith.constant dense<0.000000e+00> : vector<1x128xf32>
      %32 = tpu.matmul %30, %31, %cst_25 {dimension_numbers = #tpu.dot_dimension_numbers<[1], [0], [0], [1], [0, 0, 1, 1], [], []>} : vector<1x128xbf16>, vector<128x128xbf16>, vector<1x128xf32> -> vector<1x128xf32>
      %33 = arith.addf %22, %32 : vector<1x128xf32>
      %c0_26 = arith.constant 0 : index
      %c0_27 = arith.constant 0 : index
      %34 = vector.load %arg8[%c0_26, %c0_27] : memref<1x128xf32, #tpu.memory_space<vmem>>, vector<1x128xf32>
      %35 = arith.addf %33, %34 : vector<1x128xf32>
      %36 = arith.truncf %35 : vector<1x128xf32> to vector<1x128xbf16>
      %c0_28 = arith.constant 0 : index
      %c0_29 = arith.constant 0 : index
      %37 = vector.load %arg9[%c0_28, %c0_29] : memref<128x128xbf16, #tpu.memory_space<vmem>>, vector<128x128xbf16>
      %cst_30 = arith.constant dense<0.000000e+00> : vector<1x128xf32>
      %38 = tpu.matmul %36, %37, %cst_30 {dimension_numbers = #tpu.dot_dimension_numbers<[1], [0], [0], [1], [0, 0, 1, 1], [], []>} : vector<1x128xbf16>, vector<128x128xbf16>, vector<1x128xf32> -> vector<1x128xf32>
      %c0_31 = arith.constant 0 : index
      %c0_32 = arith.constant 0 : index
      %39 = vector.load %arg10[%c0_31, %c0_32] : memref<1x128xf32, #tpu.memory_space<vmem>>, vector<1x128xf32>
      %40 = arith.addf %38, %39 : vector<1x128xf32>
      %c0_33 = arith.constant 0 : index
      %c0_34 = arith.constant 0 : index
      %c0_35 = arith.constant 0 : index
      %41 = vector.load %arg12[%c0_33, %c0_34, %c0_35] : memref<1x1x128xf32, #tpu.memory_space<vmem>>, vector<1x1x128xf32>
      %42 = vector.shape_cast %41 : vector<1x1x128xf32> to vector<1x128xf32>
      %43 = vector.shape_cast %35 : vector<1x128xf32> to vector<1x1x128xf32>
      tpu.vector_store %arg12[%c0_33, %c0_34, %c0_35], %43 {strides = array<i32>} : memref<1x1x128xf32, #tpu.memory_space<vmem>>, vector<1x1x128xf32>,
      %c0_36 = arith.constant 0 : index
      %c0_37 = arith.constant 0 : index
      %c0_38 = arith.constant 0 : index
      %44 = vector.load %arg11[%c0_36, %c0_37, %c0_38] : memref<1x1x128xf32, #tpu.memory_space<vmem>>, vector<1x1x128xf32>
      %45 = vector.shape_cast %44 : vector<1x1x128xf32> to vector<1x128xf32>
      %46 = vector.shape_cast %40 : vector<1x128xf32> to vector<1x1x128xf32>
      tpu.vector_store %arg11[%c0_36, %c0_37, %c0_38], %46 {strides = array<i32>} : memref<1x1x128xf32, #tpu.memory_space<vmem>>, vector<1x1x128xf32>,
    } else {
    }
    return
  }
  func.func @transform_0(%arg0: i32, %arg1: i32) -> (i32, i32, i32) {
    %c0_i32 = arith.constant 0 : i32
    %c0_i32_0 = arith.constant 0 : i32
    return %arg0, %arg1, %c0_i32 : i32, i32, i32
  }
  func.func @transform_1(%arg0: i32, %arg1: i32) -> (i32, i32) {
    %c0_i32 = arith.constant 0 : i32
    %c0_i32_0 = arith.constant 0 : i32
    %c0_i32_1 = arith.constant 0 : i32
    return %c0_i32, %c0_i32_0 : i32, i32
  }
  func.func @transform_2(%arg0: i32, %arg1: i32) -> (i32, i32) {
    %c0_i32 = arith.constant 0 : i32
    %c0_i32_0 = arith.constant 0 : i32
    %c0_i32_1 = arith.constant 0 : i32
    return %c0_i32, %c0_i32_0 : i32, i32
  }
  func.func @transform_3(%arg0: i32, %arg1: i32) -> (i32, i32) {
    %c0_i32 = arith.constant 0 : i32
    %c0_i32_0 = arith.constant 0 : i32
    %c0_i32_1 = arith.constant 0 : i32
    return %c0_i32, %c0_i32_0 : i32, i32
  }
  func.func @transform_4(%arg0: i32, %arg1: i32) -> (i32, i32) {
    %c0_i32 = arith.constant 0 : i32
    %c0_i32_0 = arith.constant 0 : i32
    %c0_i32_1 = arith.constant 0 : i32
    return %c0_i32, %c0_i32_0 : i32, i32
  }
  func.func @transform_5(%arg0: i32, %arg1: i32) -> (i32, i32) {
    %c0_i32 = arith.constant 0 : i32
    %c0_i32_0 = arith.constant 0 : i32
    %c0_i32_1 = arith.constant 0 : i32
    return %c0_i32, %c0_i32_0 : i32, i32
  }
  func.func @transform_6(%arg0: i32, %arg1: i32) -> (i32, i32) {
    %c0_i32 = arith.constant 0 : i32
    %c0_i32_0 = arith.constant 0 : i32
    %c0_i32_1 = arith.constant 0 : i32
    return %c0_i32, %c0_i32_0 : i32, i32
  }
  func.func @transform_7(%arg0: i32, %arg1: i32) -> (i32, i32) {
    %c0_i32 = arith.constant 0 : i32
    %c0_i32_0 = arith.constant 0 : i32
    %c0_i32_1 = arith.constant 0 : i32
    return %c0_i32, %c0_i32_0 : i32, i32
  }
  func.func @transform_8(%arg0: i32, %arg1: i32) -> (i32, i32) {
    %c0_i32 = arith.constant 0 : i32
    %c0_i32_0 = arith.constant 0 : i32
    %c0_i32_1 = arith.constant 0 : i32
    return %c0_i32, %c0_i32_0 : i32, i32
  }
  func.func @transform_9(%arg0: i32, %arg1: i32) -> (i32, i32, i32) {
    %c0_i32 = arith.constant 0 : i32
    %c0_i32_0 = arith.constant 0 : i32
    %c0_i32_1 = arith.constant 0 : i32
    return %arg0, %c0_i32, %c0_i32_0 : i32, i32, i32
  }
  func.func @transform_10(%arg0: i32, %arg1: i32) -> (i32, i32, i32) {
    %c0_i32 = arith.constant 0 : i32
    %c0_i32_0 = arith.constant 0 : i32
    %c0_i32_1 = arith.constant 0 : i32
    return %arg0, %c0_i32, %c0_i32_0 : i32, i32, i32
  }
}

module attributes {stable_mosaic.version = 11 : i64} {
  func.func @_fused_kernel(%arg0: i32, %arg1: i32, %arg2: memref<1x64x36xbf16, #tpu.memory_space<vmem>>, %arg3: memref<36x128xbf16, #tpu.memory_space<vmem>>, %arg4: memref<1x128xf32, #tpu.memory_space<vmem>>, %arg5: memref<128x128xbf16, #tpu.memory_space<vmem>>, %arg6: memref<1x128xf32, #tpu.memory_space<vmem>>, %arg7: memref<128x128xbf16, #tpu.memory_space<vmem>>, %arg8: memref<1x128xf32, #tpu.memory_space<vmem>>, %arg9: memref<128x128xbf16, #tpu.memory_space<vmem>>, %arg10: memref<1x128xf32, #tpu.memory_space<vmem>>, %arg11: memref<1x1x128xf32, #tpu.memory_space<vmem>>, %arg12: memref<1x1x128xf32, #tpu.memory_space<vmem>>, %arg13: memref<1x128xf32, #tpu.memory_space<vmem>>) attributes {dimension_semantics = [#tpu.dimension_semantics<parallel>, #tpu.dimension_semantics<arbitrary>], iteration_bounds = array<i64: 2, 4>, scalar_prefetch = 0 : i64, scratch_operands = 1 : i64, tpu.core_type = #tpu.core_type<tc>, window_params = [{transform_indices = @transform_0, window_bounds = array<i64: 1, 64, 36>}, {pipeline_mode = #tpu.pipeline_mode<synchronous>, transform_indices = @transform_1, window_bounds = array<i64: 36, 128>}, {pipeline_mode = #tpu.pipeline_mode<synchronous>, transform_indices = @transform_2, window_bounds = array<i64: 1, 128>}, {pipeline_mode = #tpu.pipeline_mode<synchronous>, transform_indices = @transform_3, window_bounds = array<i64: 128, 128>}, {pipeline_mode = #tpu.pipeline_mode<synchronous>, transform_indices = @transform_4, window_bounds = array<i64: 1, 128>}, {pipeline_mode = #tpu.pipeline_mode<synchronous>, transform_indices = @transform_5, window_bounds = array<i64: 128, 128>}, {pipeline_mode = #tpu.pipeline_mode<synchronous>, transform_indices = @transform_6, window_bounds = array<i64: 1, 128>}, {pipeline_mode = #tpu.pipeline_mode<synchronous>, transform_indices = @transform_7, window_bounds = array<i64: 128, 128>}, {pipeline_mode = #tpu.pipeline_mode<synchronous>, transform_indices = @transform_8, window_bounds = array<i64: 1, 128>}, {transform_indices = @transform_9, window_bounds = array<i64: 1, 1, 128>}, {transform_indices = @transform_10, window_bounds = array<i64: 1, 1, 128>}]} {
    %c0_i32 = arith.constant 0 : i32
    %0 = arith.cmpi eq, %arg1, %c0_i32 : i32
    %1 = arith.extui %0 : i1 to i32
    %c0_i32_0 = arith.constant 0 : i32
    %2 = arith.cmpi ne, %1, %c0_i32_0 : i32
    scf.if %2 {
      %cst_14 = arith.constant 0.000000e+00 : f32
      %20 = vector.broadcast %cst_14 : f32 to vector<1x128xf32>
      %c0_15 = arith.constant 0 : index
      %c0_16 = arith.constant 0 : index
      %21 = vector.load %arg13[%c0_15, %c0_16] : memref<1x128xf32, #tpu.memory_space<vmem>>, vector<1x128xf32>
      tpu.vector_store %arg13[%c0_15, %c0_16], %20 {strides = array<i32>} : memref<1x128xf32, #tpu.memory_space<vmem>>, vector<1x128xf32>,
    } else {
    }
    %c0 = arith.constant 0 : index
    %c0_1 = arith.constant 0 : index
    %c0_2 = arith.constant 0 : index
    %3 = vector.load %arg2[%c0, %c0_1, %c0_2] : memref<1x64x36xbf16, #tpu.memory_space<vmem>>, vector<1x64x36xbf16>
    %4 = vector.shape_cast %3 : vector<1x64x36xbf16> to vector<64x36xbf16>
    %c0_3 = arith.constant 0 : index
    %c0_4 = arith.constant 0 : index
    %5 = vector.load %arg3[%c0_3, %c0_4] : memref<36x128xbf16, #tpu.memory_space<vmem>>, vector<36x128xbf16>
    %cst = arith.constant dense<0.000000e+00> : vector<64x128xf32>
    %6 = tpu.matmul %4, %5, %cst {dimension_numbers = #tpu.dot_dimension_numbers<[1], [0], [0], [1], [0, 0, 1, 1], [], []>} : vector<64x36xbf16>, vector<36x128xbf16>, vector<64x128xf32> -> vector<64x128xf32>
    %c0_5 = arith.constant 0 : index
    %c0_6 = arith.constant 0 : index
    %7 = vector.load %arg4[%c0_5, %c0_6] : memref<1x128xf32, #tpu.memory_space<vmem>>, vector<1x128xf32>
    %8 = vector.broadcast %7 : vector<1x128xf32> to vector<64x128xf32>
    %9 = arith.addf %6, %8 : vector<64x128xf32>
    %cst_7 = arith.constant 0.000000e+00 : f32
    %10 = vector.broadcast %cst_7 : f32 to vector<64x128xf32>
    %11 = arith.maximumf %9, %10 : vector<64x128xf32>
    %c0_8 = arith.constant 0 : index
    %c0_9 = arith.constant 0 : index
    %12 = vector.load %arg13[%c0_8, %c0_9] : memref<1x128xf32, #tpu.memory_space<vmem>>, vector<1x128xf32>
    %13 = vector.shape_cast %11 : vector<64x128xf32> to vector<1x64x128xf32>
    %cst_10 = arith.constant dense<0.000000e+00> : vector<1x128xf32>
    %14 = vector.multi_reduction <add>, %13, %cst_10 [1] : vector<1x64x128xf32> to vector<1x128xf32>
    %15 = arith.addf %12, %14 : vector<1x128xf32>
    %c0_11 = arith.constant 0 : index
    %c0_12 = arith.constant 0 : index
    %16 = vector.load %arg13[%c0_11, %c0_12] : memref<1x128xf32, #tpu.memory_space<vmem>>, vector<1x128xf32>
    tpu.vector_store %arg13[%c0_11, %c0_12], %15 {strides = array<i32>} : memref<1x128xf32, #tpu.memory_space<vmem>>, vector<1x128xf32>,
    %c3_i32 = arith.constant 3 : i32
    %17 = arith.cmpi eq, %arg1, %c3_i32 : i32
    %18 = arith.extui %17 : i1 to i32
    %c0_i32_13 = arith.constant 0 : i32
    %19 = arith.cmpi ne, %18, %c0_i32_13 : i32
    scf.if %19 {
      %c0_14 = arith.constant 0 : index
      %c0_15 = arith.constant 0 : index
      %20 = vector.load %arg13[%c0_14, %c0_15] : memref<1x128xf32, #tpu.memory_space<vmem>>, vector<1x128xf32>
      %cst_16 = arith.constant 3.906250e-03 : f32
      %21 = vector.broadcast %cst_16 : f32 to vector<1x128xf32>
      %22 = arith.mulf %20, %21 : vector<1x128xf32>
      %23 = arith.truncf %22 : vector<1x128xf32> to vector<1x128xbf16>
      %c0_17 = arith.constant 0 : index
      %c0_18 = arith.constant 0 : index
      %24 = vector.load %arg5[%c0_17, %c0_18] : memref<128x128xbf16, #tpu.memory_space<vmem>>, vector<128x128xbf16>
      %cst_19 = arith.constant dense<0.000000e+00> : vector<1x128xf32>
      %25 = tpu.matmul %23, %24, %cst_19 {dimension_numbers = #tpu.dot_dimension_numbers<[1], [0], [0], [1], [0, 0, 1, 1], [], []>} : vector<1x128xbf16>, vector<128x128xbf16>, vector<1x128xf32> -> vector<1x128xf32>
      %c0_20 = arith.constant 0 : index
      %c0_21 = arith.constant 0 : index
      %26 = vector.load %arg6[%c0_20, %c0_21] : memref<1x128xf32, #tpu.memory_space<vmem>>, vector<1x128xf32>
      %27 = arith.addf %25, %26 : vector<1x128xf32>
      %cst_22 = arith.constant 0.000000e+00 : f32
      %28 = vector.broadcast %cst_22 : f32 to vector<1x128xf32>
      %29 = arith.maximumf %27, %28 : vector<1x128xf32>
      %30 = arith.truncf %29 : vector<1x128xf32> to vector<1x128xbf16>
      %c0_23 = arith.constant 0 : index
      %c0_24 = arith.constant 0 : index
      %31 = vector.load %arg7[%c0_23, %c0_24] : memref<128x128xbf16, #tpu.memory_space<vmem>>, vector<128x128xbf16>
      %cst_25 = arith.constant dense<0.000000e+00> : vector<1x128xf32>
      %32 = tpu.matmul %30, %31, %cst_25 {dimension_numbers = #tpu.dot_dimension_numbers<[1], [0], [0], [1], [0, 0, 1, 1], [], []>} : vector<1x128xbf16>, vector<128x128xbf16>, vector<1x128xf32> -> vector<1x128xf32>
      %33 = arith.addf %22, %32 : vector<1x128xf32>
      %c0_26 = arith.constant 0 : index
      %c0_27 = arith.constant 0 : index
      %34 = vector.load %arg8[%c0_26, %c0_27] : memref<1x128xf32, #tpu.memory_space<vmem>>, vector<1x128xf32>
      %35 = arith.addf %33, %34 : vector<1x128xf32>
      %36 = arith.truncf %35 : vector<1x128xf32> to vector<1x128xbf16>
      %c0_28 = arith.constant 0 : index
      %c0_29 = arith.constant 0 : index
      %37 = vector.load %arg9[%c0_28, %c0_29] : memref<128x128xbf16, #tpu.memory_space<vmem>>, vector<128x128xbf16>
      %cst_30 = arith.constant dense<0.000000e+00> : vector<1x128xf32>
      %38 = tpu.matmul %36, %37, %cst_30 {dimension_numbers = #tpu.dot_dimension_numbers<[1], [0], [0], [1], [0, 0, 1, 1], [], []>} : vector<1x128xbf16>, vector<128x128xbf16>, vector<1x128xf32> -> vector<1x128xf32>
      %c0_31 = arith.constant 0 : index
      %c0_32 = arith.constant 0 : index
      %39 = vector.load %arg10[%c0_31, %c0_32] : memref<1x128xf32, #tpu.memory_space<vmem>>, vector<1x128xf32>
      %40 = arith.addf %38, %39 : vector<1x128xf32>
      %c0_33 = arith.constant 0 : index
      %c0_34 = arith.constant 0 : index
      %c0_35 = arith.constant 0 : index
      %41 = vector.load %arg12[%c0_33, %c0_34, %c0_35] : memref<1x1x128xf32, #tpu.memory_space<vmem>>, vector<1x1x128xf32>
      %42 = vector.shape_cast %41 : vector<1x1x128xf32> to vector<1x128xf32>
      %43 = vector.shape_cast %35 : vector<1x128xf32> to vector<1x1x128xf32>
      tpu.vector_store %arg12[%c0_33, %c0_34, %c0_35], %43 {strides = array<i32>} : memref<1x1x128xf32, #tpu.memory_space<vmem>>, vector<1x1x128xf32>,
      %c0_36 = arith.constant 0 : index
      %c0_37 = arith.constant 0 : index
      %c0_38 = arith.constant 0 : index
      %44 = vector.load %arg11[%c0_36, %c0_37, %c0_38] : memref<1x1x128xf32, #tpu.memory_space<vmem>>, vector<1x1x128xf32>
      %45 = vector.shape_cast %44 : vector<1x1x128xf32> to vector<1x128xf32>
      %46 = vector.shape_cast %40 : vector<1x128xf32> to vector<1x1x128xf32>
      tpu.vector_store %arg11[%c0_36, %c0_37, %c0_38], %46 {strides = array<i32>} : memref<1x1x128xf32, #tpu.memory_space<vmem>>, vector<1x1x128xf32>,
    } else {
    }
    return
  }
  func.func @transform_0(%arg0: i32, %arg1: i32) -> (i32, i32, i32) {
    %c0_i32 = arith.constant 0 : i32
    %c0_i32_0 = arith.constant 0 : i32
    return %arg0, %arg1, %c0_i32 : i32, i32, i32
  }
  func.func @transform_1(%arg0: i32, %arg1: i32) -> (i32, i32) {
    %c0_i32 = arith.constant 0 : i32
    %c0_i32_0 = arith.constant 0 : i32
    %c0_i32_1 = arith.constant 0 : i32
    return %c0_i32, %c0_i32_0 : i32, i32
  }
  func.func @transform_2(%arg0: i32, %arg1: i32) -> (i32, i32) {
    %c0_i32 = arith.constant 0 : i32
    %c0_i32_0 = arith.constant 0 : i32
    %c0_i32_1 = arith.constant 0 : i32
    return %c0_i32, %c0_i32_0 : i32, i32
  }
  func.func @transform_3(%arg0: i32, %arg1: i32) -> (i32, i32) {
    %c0_i32 = arith.constant 0 : i32
    %c0_i32_0 = arith.constant 0 : i32
    %c0_i32_1 = arith.constant 0 : i32
    return %c0_i32, %c0_i32_0 : i32, i32
  }
  func.func @transform_4(%arg0: i32, %arg1: i32) -> (i32, i32) {
    %c0_i32 = arith.constant 0 : i32
    %c0_i32_0 = arith.constant 0 : i32
    %c0_i32_1 = arith.constant 0 : i32
    return %c0_i32, %c0_i32_0 : i32, i32
  }
  func.func @transform_5(%arg0: i32, %arg1: i32) -> (i32, i32) {
    %c0_i32 = arith.constant 0 : i32
    %c0_i32_0 = arith.constant 0 : i32
    %c0_i32_1 = arith.constant 0 : i32
    return %c0_i32, %c0_i32_0 : i32, i32
  }
  func.func @transform_6(%arg0: i32, %arg1: i32) -> (i32, i32) {
    %c0_i32 = arith.constant 0 : i32
    %c0_i32_0 = arith.constant 0 : i32
    %c0_i32_1 = arith.constant 0 : i32
    return %c0_i32, %c0_i32_0 : i32, i32
  }
  func.func @transform_7(%arg0: i32, %arg1: i32) -> (i32, i32) {
    %c0_i32 = arith.constant 0 : i32
    %c0_i32_0 = arith.constant 0 : i32
    %c0_i32_1 = arith.constant 0 : i32
    return %c0_i32, %c0_i32_0 : i32, i32
  }
  func.func @transform_8(%arg0: i32, %arg1: i32) -> (i32, i32) {
    %c0_i32 = arith.constant 0 : i32
    %c0_i32_0 = arith.constant 0 : i32
    %c0_i32_1 = arith.constant 0 : i32
    return %c0_i32, %c0_i32_0 : i32, i32
  }
  func.func @transform_9(%arg0: i32, %arg1: i32) -> (i32, i32, i32) {
    %c0_i32 = arith.constant 0 : i32
    %c0_i32_0 = arith.constant 0 : i32
    %c0_i32_1 = arith.constant 0 : i32
    return %arg0, %c0_i32, %c0_i32_0 : i32, i32, i32
  }
  func.func @transform_10(%arg0: i32, %arg1: i32) -> (i32, i32, i32) {
    %c0_i32 = arith.constant 0 : i32
    %c0_i32_0 = arith.constant 0 : i32
    %c0_i32_1 = arith.constant 0 : i32
    return %arg0, %c0_i32, %c0_i32_0 : i32, i32, i32
  }
}

</mosaic_0001>

<bundles_post_ra>
// kernel: tpu_custom_call.1
= control target key start
LH: loop header
LB: loop body
LE: loop exit
PB: predicated region body
PF: predicated region fallthrough
CT: control target
= control target key end

     0   :  { %s1579_s0 = inlined_call_operand.vmem [shape: bf16[2,256,36], index: 0, kind: input, shape index: {}]   ;;  %s1580_s1 = inlined_call_operand.vmem [shape: bf16[36,128], index: 1, kind: input, shape index: {}]   ;;  %s1581_s2 = inlined_call_operand.vmem [shape: f32[1,128], index: 2, kind: input, shape index: {}]   ;;  %s1582_s3 = inlined_call_operand.vmem [shape: bf16[128,128], index: 3, kind: input, shape index: {}]   ;;  %s1583_s4 = inlined_call_operand.vmem [shape: f32[1,128], index: 4, kind: input, shape index: {}]   ;;  %s1584_s5 = inlined_call_operand.vmem [shape: bf16[128,128], index: 5, kind: input, shape index: {}]   ;;  %s1585_s6 = inlined_call_operand.vmem [shape: f32[1,128], index: 6, kind: input, shape index: {}]   ;;  %s1586_s7 = inlined_call_operand.vmem [shape: bf16[128,128], index: 7, kind: input, shape index: {}]   ;;  %s1587_s8 = inlined_call_operand.vmem [shape: f32[1,128], index: 8, kind: input, shape index: {}]   ;;  %s1588_s9 = inlined_call_operand.hbm [shape: f32[2,1,128], index: 9, kind: output, shape index: {0}]   ;;  %s1589_s10 = inlined_call_operand.hbm [shape: f32[2,1,128], index: 10, kind: output, shape index: {1}]  }
   0x1   :  { %1594 = sst [smem:[#allocation15_spill]] %s1579_s0 }
   0x2   :  { %16 = vsyncpa [#allocation4], 0 }
   0x3   :  { %18 = vsyncpa [#allocation4 + $0x1], 0 }
   0x4   :  { %19 = vsyncpa [#allocation6], 0 }
   0x5   :  { %21 = vsyncpa [#allocation6 + $0x1], 0  ;;  %s1338_s13 = smov 0   ;;  %s1340_s14 = smov 0  }
   0x6   :  { %s1342_s15 = smov 0   ;;  %s1344_s16 = smov 0  }
   0x7   :  { %s1346_s17 = smov 0   ;;  %s1348_s18 = smov 0  }
   0x8   :  { %s1350_s19 = smov 0   ;;  %s1352_s20 = smov 0  }
   0x9 LB: > { %1595 = sst [smem:[#allocation9_spill]] %s1260_s15  ;;  %s901_s21 = sadd.s32 4294967295, %s1280_s20   ;;  %s1280_s20 = sphi %s1352_s20, %s27_s20   ;;  %s1276_s19 = sphi %s1350_s19, %s1609_s19   ;;  %s1272_s18 = sphi %s1348_s18, %s1608_s18   ;;  %s1268_s17 = sphi %s1346_s17, %s1607_s17   ;;  %s1264_s16 = sphi %s1344_s16, %s1606_s16   ;;  %s1260_s15 = sphi %s1342_s15, %s1605_s15   ;;  %s1256_s14 = sphi %s1340_s14, %s1611_s14   ;;  %s1252_s13 = sphi %s1338_s13, %s1610_s13  }
   0xa   : > { %1596 = sst [smem:[#allocation10_spill]] %s1272_s18  ;;  %s902_s22 = sadd.s32 4294967294, %s1280_s20  }
   0xb   : > { %1597 = sst [smem:[#allocation11_spill]] %s1276_s19  ;;  %s36_s23 = sadd.s32 1, %s1272_s18 }
   0xc   : > { %p37_p0 = scmp.ge.s32.totalorder %s36_s23, 4  ;;  %s39_s24 = sadd.s32 1, %s1276_s19 }
   0xd   : > { %p252_p1 = scmp.ne.s32.totalorder %s1260_s15, %s1256_s14  ;;  %p253_p2 = scmp.eq.s32.totalorder %s901_s21, 7 }
   0xe   : > { %s1613_s23 = smov (%p37_p0, %s36_s23), 0  ;;  %s1615_s24 = smov (!%p37_p0, %s39_s24), %s1276_s19 }
   0xf   : > { %1598 = sst [smem:[#allocation12_spill]] %s1613_s23  ;;  %p1387_p3 = por %p253_p2, %p252_p1 }
  0x10   : > { %p258_p4 = scmp.ne.s32.totalorder %s1256_s14, %s1252_s13  ;;  %p41_p5 = scmp.ge.s32.totalorder %s1615_s24, 2 }
  0x11   : > { %p259_p6 = scmp.eq.s32.totalorder %s902_s22, 7  ;;  %p905_p7 = scmp.ge.s32.totalorder %s1280_s20, 1 }
  0x12   : > { %p340_p8 = scmp.lt.s32.totalorder %s1280_s20, 9  ;;  %s1617_s24 = smov (%p41_p5, %s1615_s24), 0 }
  0x13   : > { %1600 = sst [smem:[#allocation13_spill]] %s1617_s24  ;;  %p1397_p9 = por %p259_p6, %p258_p4 }
  0x14   : > { %p341_p10 = pnand %p905_p7, %p340_p8  ;;  %s239_s27 = ssub.s32 %s1276_s19, %s1617_s24 }
  0x15   : > { %s242_s28 = sadd.s32 1, %s1260_s15  ;;  %p240_p11 = scmp.eq.s32.totalorder %s239_s27, 0 }
  0x16   : > { %344 = sbr.rel (%p341_p10) target bundleno = 686 (0x2ae), region = 56  ;;  %s1408_s30 = sand.u32 (!%p341_p10), 1, %s1256_s14  }
  0x17   : > { %s1405_s29 = scalar_select %p240_p11, %s1260_s15, %s242_s28  }
  0x18   : > { %s906_s11 = sshll.u32 (!%p341_p10), %s1264_s16, 3  ;;  %p386_p12 = scmp.lt.s32.totalorder (!%p341_p10), %s1268_s17, 1 }
  0x19   : > { %1602 = sst [smem:[#allocation14_spill]] %s1405_s29  ;;  %p388_p13 = scmp.lt.s32.totalorder (!%p341_p10), %s906_s11, 31 }
  0x1a   : > { %s1603_s0 = sld [smem:[#allocation15_spill]] (!%p341_p10)  ;;  %s378_s19 = scalar_lea.vmem (!%p341_p10), [#allocation3], %s1408_s30 }
  0x1b   : > { %s387_s12 = scalar_select %p386_p12, %s1268_s17, 1 }
  0x1c   : > { %s1619_s11 = smov (!%p388_p13, %s906_s11), 31  ;;  %s384_s18 = scalar_lea.vmem [#allocation5], %s1408_s30 }
  0x1d   : > { %s907_s21 = sshll.u32 %s387_s12, 5  ;;  %p909_p0 = scmp.ne.s32.totalorder %s1264_s16, 0 }
  0x1e   : > { %s391_s22 = sadd.s32 %s907_s21, %s1619_s11 }
  0x1f   : > { %s908_s24 = sshll.u32 %s391_s22, 2  ;;  %399 = sbr.rel (%p909_p0) target bundleno = 38 (0x26), region = 60 }
  0x20   : > { %s393_s23 = scalar_lea.vmem %s1603_s0, %s908_s24 }
  0x24   : > { %v1282_v0 = vmov 0.0  }
  0x25   : > { %400 = vst [vmem:[#allocation2] sm:$0x1] %v1282_v0 }
  0x26 PF: > { %v413_v1 = vld [vmem:[%s1580_s1 + $0x10] sm:$0x3]  ;;  %vm466_vm0 = vcmask 1041408   ;;  %v1042_v5 = vld [vmem:[%s1580_s1 + $0x8] sm:$0xff]  ;;  %v1041_v6 = vld [vmem:[%s1580_s1] sm:$0xff]  ;;  %vm453_vm1 = vcmask 293888  }
  0x27   : > { %v447_v2 = vunpack.c.l.b16 %v413_v1  ;;  %v1037_v7 = vld [vmem:[%s393_s23] sm:$0xff]  ;;  %v1038_v8 = vld [vmem:[%s393_s23 + $0x8] sm:$0xff]  ;;  %v1039_v9 = vld [vmem:[%s393_s23 + $0x10] sm:$0xff]  ;;  %p938_p1 = scmp.ne.s32.totalorder %s1264_s16, 3 }
  0x28   : > { %v1040_v10 = vld [vmem:[%s393_s23 + $0x18] sm:$0xff]  ;;  %v1153_v13 = vld [vmem:[%s1581_s2] ss:$0 sm:$0xff] }
  0x29   : > { %v450_v3 = vpack.c.b16 %v447_v2, %v447_v2 }
  0x2b   : > { %v468_v4 = vsel %vm466_vm0, %v450_v3, 0 }
  0x2c   : > { %475 = vmatpush.bf16.msra.mxu0 %v468_v4  ;;  %1067 = vmatpush.bf16.msra.mxu1 %v468_v4  ;;  %v507_v48 = vld [vmem:[#allocation2] sm:$0x1] }
  0x2d   : > { %1068 = vmatpush.bf16.msra.mxu2 %v468_v4  ;;  %1069 = vmatpush.bf16.msra.mxu3 %v468_v4 }
  0x30   : > { %476 = vmatpush.bf16.msra.mxu0 %v1042_v5  ;;  %1070 = vmatpush.bf16.msra.mxu1 %v1042_v5 }
  0x31   : > { %1071 = vmatpush.bf16.msra.mxu2 %v1042_v5  ;;  %1072 = vmatpush.bf16.msra.mxu3 %v1042_v5 }
  0x34   : > { %477 = vmatpush.bf16.msra.mxu0 %v1041_v6  ;;  %1073 = vmatpush.bf16.msra.mxu1 %v1041_v6 }
  0x35   : > { %1074 = vmatpush.bf16.msra.mxu2 %v1041_v6  ;;  %1075 = vmatpush.bf16.msra.mxu3 %v1041_v6 }
  0x37   : > { %934 = vmatmul.msk.bf16.vlgmr.msra.gmra.mxu0 %vm453_vm1, %v1037_v7  ;;  %935 = vmatmul.msk.bf16.vlgmr.msra.gmra.mxu1 %vm453_vm1, %v1038_v8 }
  0x38   : > { %936 = vmatmul.msk.bf16.vlgmr.msra.gmra.mxu2 %vm453_vm1, %v1039_v9  ;;  %937 = vmatmul.msk.bf16.vlgmr.msra.gmra.mxu3 %vm453_vm1, %v1040_v10 }
  0xb4   : > { %v479_v11 = vpop.f32.mrf.mxu0  ;;  %v484_v12 = vpop.f32.mrf.mxu1 }
  0xb5   : > { %v480_v14 = vadd.f32 %v1153_v13, %v479_v11  ;;  %v485_v19 = vadd.f32 %v1153_v13, %v484_v12 }
  0xb7   : > { %v499_v21 = vmax.f32 %v480_v14, 0.0  ;;  %v501_v24 = vmax.f32 %v485_v19, 0.0 }
  0xbb   : > { %v489_v15 = vpop.f32.mrf.mxu2  ;;  %v494_v16 = vpop.f32.mrf.mxu3 }
  0xbc   : > { %v481_v17 = vpop.f32.mrf.mxu0  ;;  %v486_v18 = vpop.f32.mrf.mxu1  ;;  %v490_v25 = vadd.f32 %v1153_v13, %v489_v15  ;;  %v495_v33 = vadd.f32 %v1153_v13, %v494_v16 }
  0xbd   : > { %v482_v20 = vadd.f32 %v1153_v13, %v481_v17  ;;  %v487_v23 = vadd.f32 %v1153_v13, %v486_v18 }
  0xbe   : > { %v503_v32 = vmax.f32 %v490_v25, 0.0  ;;  %v505_v38 = vmax.f32 %v495_v33, 0.0 }
  0xbf   : > { %v500_v22 = vmax.f32 %v482_v20, 0.0  ;;  %v502_v27 = vmax.f32 %v487_v23, 0.0 }
  0xc1   : > { %v508_v26 = vadd.f32 %v500_v22, %v499_v21 }
  0xc3   : > { %v509_v28 = vadd.f32 %v508_v26, %v501_v24  ;;  %v491_v29 = vpop.f32.mrf.mxu2  ;;  %v496_v31 = vpop.f32.mrf.mxu3 }
  0xc4   : > { %v492_v30 = vadd.f32 %v1153_v13, %v491_v29  ;;  %v497_v37 = vadd.f32 %v1153_v13, %v496_v31 }
  0xc5   : > { %v510_v34 = vadd.f32 %v509_v28, %v502_v27 }
  0xc6   : > { %v504_v35 = vmax.f32 %v492_v30, 0.0  ;;  %v506_v40 = vmax.f32 %v497_v37, 0.0 }
  0xc7   : > { %v511_v36 = vadd.f32 %v510_v34, %v503_v32 }
  0xc9   : > { %v512_v39 = vadd.f32 %v511_v36, %v504_v35 }
  0xcb   : > { %v513_v41 = vadd.f32 %v512_v39, %v505_v38 }
  0xcd   : > { %v514_v42 = vadd.f32 %v513_v41, %v506_v40 }
  0xcf   : > { %v515_v43 = vrot.slane %v514_v42, 4 }
  0xd1   : > { %v516_v44 = vadd.f32 %v515_v43, %v514_v42 }
  0xd3   : > { %v517_v45 = vrot.slane %v516_v44, 2 }
  0xd5   : > { %v518_v46 = vadd.f32 %v517_v45, %v516_v44 }
  0xd7   : > { %v519_v47 = vrot.slane %v518_v46, 1 }
  0xd9   : > { %v520_v49 = vadd.f32 %v519_v47, %v518_v46  ;;  %526 = sbr.rel (%p938_p1) target bundleno = 658 (0x292), region = 64 }
  0xdb   : > { %v521_v50 = vadd.f32 %v520_v49, %v507_v48 }
  0xdd   : > { %522 = vst [vmem:[#allocation2] sm:$0x1] %v521_v50 }
  0xde   : > { %v1050_v51 = vld [vmem:[%s1582_s3 + $0x38] sm:$0xff]  ;;  %v1049_v52 = vld [vmem:[%s1582_s3 + $0x30] sm:$0xff]  ;;  %v1048_v55 = vld [vmem:[%s1582_s3 + $0x28] sm:$0xff] }
  0xdf   : > { %595 = vmatpush.bf16.msra.mxu0 %v1050_v51  ;;  %v1058_v53 = vld [vmem:[%s1584_s5 + $0x38] sm:$0xff]  ;;  %v1057_v54 = vld [vmem:[%s1584_s5 + $0x30] sm:$0xff]  ;;  %v1056_v56 = vld [vmem:[%s1584_s5 + $0x28] sm:$0xff] }
  0xe0   : > { %674 = vmatpush.bf16.msra.mxu1 %v1058_v53  ;;  %v1047_v57 = vld [vmem:[%s1582_s3 + $0x20] sm:$0xff]  ;;  %v1046_v59 = vld [vmem:[%s1582_s3 + $0x18] sm:$0xff]  ;;  %v1045_v61 = vld [vmem:[%s1582_s3 + $0x10] sm:$0xff] }
  0xe1   : > { %v1055_v58 = vld [vmem:[%s1584_s5 + $0x20] sm:$0xff]  ;;  %v1054_v60 = vld [vmem:[%s1584_s5 + $0x18] sm:$0xff]  ;;  %v1053_v62 = vld [vmem:[%s1584_s5 + $0x10] sm:$0xff] }
  0xe2   : > { %v1044_v63 = vld [vmem:[%s1582_s3 + $0x8] sm:$0xff]  ;;  %v1043_v2 = vld [vmem:[%s1582_s3] sm:$0xff]  ;;  %v1066_v6 = vld [vmem:[%s1586_s7 + $0x38] sm:$0xff] }
  0xe3   : > { %596 = vmatpush.bf16.msra.mxu0 %v1049_v52  ;;  %v1052_v4 = vld [vmem:[%s1584_s5 + $0x8] sm:$0xff]  ;;  %v1051_v5 = vld [vmem:[%s1584_s5] sm:$0xff]  ;;  %756 = vmatpush.bf16.msra.mxu2 %v1066_v6  ;;  %v1065_v7 = vld [vmem:[%s1586_s7 + $0x30] sm:$0xff] }
  0xe4   : > { %675 = vmatpush.bf16.msra.mxu1 %v1057_v54  ;;  %v527_v0 = vld [vmem:[#allocation2] sm:$0x1]  ;;  %v1064_v8 = vld [vmem:[%s1586_s7 + $0x28] sm:$0xff]  ;;  %v1062_v10 = vld [vmem:[%s1586_s7 + $0x18] sm:$0xff] }
  0xe5   : > { %v528_v1 = vmul.f32 0.00390625, %v527_v0  ;;  %v1063_v9 = vld [vmem:[%s1586_s7 + $0x20] sm:$0xff]  ;;  %v1061_v11 = vld [vmem:[%s1586_s7 + $0x10] sm:$0xff]  ;;  %v1060_v18 = vld [vmem:[%s1586_s7 + $0x8] sm:$0xff] }
  0xe6   : > { %v546_v12 = vld [vmem:[%s1583_s4] sm:$0x1] }
  0xe7   : > { %597 = vmatpush.bf16.msra.mxu0 %v1048_v55  ;;  %v529_v3 = vpack.c.bf16 %v528_v1, %v528_v1  ;;  %757 = vmatpush.bf16.msra.mxu2 %v1065_v7  ;;  %v1059_v19 = vld [vmem:[%s1586_s7] sm:$0xff] }
  0xe8   : > { %676 = vmatpush.bf16.msra.mxu1 %v1056_v56  ;;  %v688_v21 = vld [vmem:[%s1585_s6] sm:$0x1] }
  0xe9   : > { %v707_v26 = vld [vmem:[%s1587_s8] sm:$0x1] }
  0xeb   : > { %598 = vmatpush.bf16.msra.mxu0 %v1047_v57  ;;  %758 = vmatpush.bf16.msra.mxu2 %v1064_v8 }
  0xec   : > { %677 = vmatpush.bf16.msra.mxu1 %v1055_v58 }
  0xef   : > { %599 = vmatpush.bf16.msra.mxu0 %v1046_v59  ;;  %759 = vmatpush.bf16.msra.mxu2 %v1063_v9 }
  0xf0   : > { %678 = vmatpush.bf16.msra.mxu1 %v1054_v60 }
  0xf3   : > { %600 = vmatpush.bf16.msra.mxu0 %v1045_v61  ;;  %760 = vmatpush.bf16.msra.mxu2 %v1062_v10 }
  0xf4   : > { %679 = vmatpush.bf16.msra.mxu1 %v1053_v62 }
  0xf7   : > { %601 = vmatpush.bf16.msra.mxu0 %v1044_v63  ;;  %761 = vmatpush.bf16.msra.mxu2 %v1061_v11 }
  0xf8   : > { %680 = vmatpush.bf16.msra.mxu1 %v1052_v4 }
  0xfb   : > { %602 = vmatpush.bf16.msra.mxu0 %v1043_v2  ;;  %762 = vmatpush.bf16.msra.mxu2 %v1060_v18 }
  0xfc   : > { %681 = vmatpush.bf16.msra.mxu1 %v1051_v5 }
  0xfe   : > { %603 = vmatmul.bf16.vlgmr.msra.gmra.mxu0 %v529_v3 }
  0xff   : > { %763 = vmatpush.bf16.msra.mxu2 %v1059_v19 }
 0x17b   : > { %v604_v13 = vpop.f32.mrf.mxu0 }
 0x17c   : > { %v605_v14 = vadd.f32 %v604_v13, %v546_v12 }
 0x17e   : > { %v608_v15 = vmax.f32 %v605_v14, 0.0 }
 0x180   : > { %v609_v16 = vpack.c.bf16 %v608_v15, %v608_v15 }
 0x182   : > { %682 = vmatmul.bf16.vlgmr.msra.gmra.mxu1 %v609_v16 }
 0x183   : > { %v606_v17 = vpop.f32.mrf.mxu0 }
 0x1ff   : > { %v683_v20 = vpop.f32.mrf.mxu1 }
 0x200   : > { %v687_v22 = vadd.f32 %v683_v20, %v528_v1 }
 0x202   : > { %v689_v23 = vadd.f32 %v688_v21, %v687_v22 }
 0x204   : > { %769 = vst [vmem:[%s384_s18] sm:$0x1] %v689_v23  ;;  %v690_v24 = vpack.c.bf16 %v689_v23, %v689_v23 }
 0x206   : > { %764 = vmatmul.bf16.vlgmr.msra.gmra.mxu2 %v690_v24 }
 0x207   : > { %v685_v25 = vpop.f32.mrf.mxu1 }
 0x289   : > { %v765_v27 = vpop.f32.mrf.mxu2 }
 0x28a   : > { %v766_v28 = vadd.f32 %v765_v27, %v707_v26 }
 0x28c   : > { %770 = vst [vmem:[%s378_s19] sm:$0x1] %v766_v28 }
 0x291   : > { %v767_v29 = vpop.f32.mrf.mxu2 }
 0x292 PF: > { %s784_s22 = scalar_lea.hbm %s1588_s9, %s1268_s17  ;;  %s786_s27 = sshll.u32 %s378_s19, 4  ;;  %s787_s27 = int_to_ptr.vmem [resolvable:$true] %s786_s27 }
 0x293   : > { %s788_s28 = sshll.u32 %s784_s22, 4  ;;  %s772_s11 = scalar_lea.sflag [#allocation4], %s1408_s30  ;;  %s789_s28 = int_to_ptr.hbm [resolvable:$true] %s788_s28 }
 0x294   : > { %s1168_s24 = sshra.s32 %s789_s28, 4  ;;  %s1174_s15 = scalar_lea.hbm %s1588_s9, 2  ;;  %s1169_s24 = int_to_ptr.hbm [resolvable:$true] %s1168_s24 }
 0x295   : > { %s1170_s12 = scalar_lea.hbm %s1169_s24, 1  ;;  %p1175_p6 = scmp.lt.s32.totalorder %s1169_s24, %s1588_s9 }
 0x296   : > { %p1171_p2 = scmp.ne.s32.totalorder %s1169_s24, %s1170_s12  ;;  %p1176_p7 = scmp.lt.s32.totalorder %s1174_s15, %s1170_s12 }
 0x298   : > { %p1172_p4 = pnand %p1171_p2, %p1387_p3  ;;  %p1177_p8 = por %p1176_p7, %p1175_p6 }
 0x29a   : > { %p1173_p5 = pneg %p1172_p4 }
 0x29c   : > { %p1178_p10 = pnand %p1177_p8, %p1173_p5 }
 0x29e   : > { %1181 = shalt.err (!%p1178_p10)
}
 0x29f   : > { %1076 = dma.vmem_to_hbm [thread:$0]  (%p1387_p3), %s787_s27, 16, %s789_s28, %s772_s11  }
 0x2a0   : > { %s797_s21 = scalar_lea.hbm %s1589_s10, %s1268_s17  ;;  %s799_s16 = sshll.u32 %s384_s18, 4  ;;  %s800_s16 = int_to_ptr.vmem [resolvable:$true] %s799_s16 }
 0x2a1   : > { %s801_s0 = sshll.u32 %s797_s21, 4  ;;  %s776_s24 = scalar_lea.sflag [#allocation6], %s1408_s30  ;;  %s802_s0 = int_to_ptr.hbm [resolvable:$true] %s801_s0 }
 0x2a2   : > { %s1196_s12 = sshra.s32 %s802_s0, 4  ;;  %s1202_s27 = scalar_lea.hbm %s1589_s10, 2  ;;  %s1197_s12 = int_to_ptr.hbm [resolvable:$true] %s1196_s12 }
 0x2a3   : > { %s1198_s15 = scalar_lea.hbm %s1197_s12, 1  ;;  %p1203_p0 = scmp.lt.s32.totalorder %s1197_s12, %s1589_s10 }
 0x2a4   : > { %p1199_p11 = scmp.ne.s32.totalorder %s1197_s12, %s1198_s15  ;;  %p1204_p1 = scmp.lt.s32.totalorder %s1202_s27, %s1198_s15 }
 0x2a6   : > { %p1200_p12 = pnand %p1199_p11, %p1387_p3  ;;  %p1205_p2 = por %p1204_p1, %p1203_p0 }
 0x2a8   : > { %p1201_p13 = pneg %p1200_p12 }
 0x2aa   : > { %p1206_p4 = pnand %p1205_p2, %p1201_p13 }
 0x2ac   : > { %1209 = shalt.err (!%p1206_p4)
}
 0x2ad   : > { %1077 = dma.vmem_to_hbm [thread:$0]  (%p1387_p3), %s800_s16, 16, %s802_s0, %s776_s24  }
 0x2ae PF: > { %p1087_p5 = scmp.ge.s32.totalorder %s1280_s20, 2  ;;  %s813_s17 = sand.u32 1, %s1252_s13  }
 0x2af   : > { %s814_s18 = scalar_lea.sflag [#allocation4], %s813_s17 }
 0x2b0   : > { %p1081_p6 = pnand %p1087_p5, %p1397_p9 }
 0x2b2   : > { %p1082_p7 = pneg %p1081_p6 }
 0x2b4   : > { %1243 = dma.done.wait (%p1082_p7), %s814_s18, 16  }
 0x2b5   : > { %1245 = vsyncadd (%p1082_p7), %s814_s18, 4294967280  ;;  %s823_s30 = scalar_lea.sflag [#allocation6], %s813_s17 }
 0x2b6   : > { %1247 = dma.done.wait (%p1082_p7), %s823_s30, 16  }
 0x2b7   : > { %1249 = vsyncadd (%p1082_p7), %s823_s30, 4294967280  ;;  %s27_s20 = sadd.s32 1, %s1280_s20   ;;  %s1604_s0 = sld [smem:[#allocation9_spill]] }
 0x2b8   : > { %p24_p8 = scmp.ge.s32.totalorder %s27_s20, 10   ;;  %s1605_s15 = sld [smem:[#allocation14_spill]] }
 0x2b9   : > { %s1606_s16 = sld [smem:[#allocation10_spill]]  ;;  %s1610_s13 = smov %s1256_s14 }
 0x2ba   : > { %s1607_s17 = sld [smem:[#allocation11_spill]]  ;;  %26 = sbr.rel (!%p24_p8) target bundleno = 9 (0x9), region = 116 }
 0x2bb   : > { %s1608_s18 = sld [smem:[#allocation12_spill]] }
 0x2bc   : > { %s1609_s19 = sld [smem:[#allocation13_spill]] }
 0x2bd   : > { %s1611_s14 = smov %s1604_s0 }
 0x2bf   :  { %828 = vsyncpa [#allocation4], 1 }
 0x2c0   :  { %830 = vsyncpa [#allocation4 + $0x1], 1 }
 0x2c1   :  { %831 = vsyncpa [#allocation6], 1 }
 0x2c2   :  { %833 = vsyncpa [#allocation6 + $0x1], 1 }

// kernel: tpu_custom_call.1
= control target key start
LH: loop header
LB: loop body
LE: loop exit
PB: predicated region body
PF: predicated region fallthrough
CT: control target
= control target key end

     0   :  { %s1579_s0 = inlined_call_operand.vmem [shape: bf16[2,256,36], index: 0, kind: input, shape index: {}]   ;;  %s1580_s1 = inlined_call_operand.vmem [shape: bf16[36,128], index: 1, kind: input, shape index: {}]   ;;  %s1581_s2 = inlined_call_operand.vmem [shape: f32[1,128], index: 2, kind: input, shape index: {}]   ;;  %s1582_s3 = inlined_call_operand.vmem [shape: bf16[128,128], index: 3, kind: input, shape index: {}]   ;;  %s1583_s4 = inlined_call_operand.vmem [shape: f32[1,128], index: 4, kind: input, shape index: {}]   ;;  %s1584_s5 = inlined_call_operand.vmem [shape: bf16[128,128], index: 5, kind: input, shape index: {}]   ;;  %s1585_s6 = inlined_call_operand.vmem [shape: f32[1,128], index: 6, kind: input, shape index: {}]   ;;  %s1586_s7 = inlined_call_operand.vmem [shape: bf16[128,128], index: 7, kind: input, shape index: {}]   ;;  %s1587_s8 = inlined_call_operand.vmem [shape: f32[1,128], index: 8, kind: input, shape index: {}]   ;;  %s1588_s9 = inlined_call_operand.hbm [shape: f32[2,1,128], index: 9, kind: output, shape index: {0}]   ;;  %s1589_s10 = inlined_call_operand.hbm [shape: f32[2,1,128], index: 10, kind: output, shape index: {1}]  }
   0x1   :  { %1594 = sst [smem:[#allocation15_spill]] %s1579_s0 }
   0x2   :  { %16 = vsyncpa [#allocation4], 0 }
   0x3   :  { %18 = vsyncpa [#allocation4 + $0x1], 0 }
   0x4   :  { %19 = vsyncpa [#allocation6], 0 }
   0x5   :  { %21 = vsyncpa [#allocation6 + $0x1], 0  ;;  %s1338_s13 = smov 0   ;;  %s1340_s14 = smov 0  }
   0x6   :  { %s1342_s15 = smov 0   ;;  %s1344_s16 = smov 0  }
   0x7   :  { %s1346_s17 = smov 0   ;;  %s1348_s18 = smov 0  }
   0x8   :  { %s1350_s19 = smov 0   ;;  %s1352_s20 = smov 0  }
   0x9 LB: > { %1595 = sst [smem:[#allocation9_spill]] %s1260_s15  ;;  %s901_s21 = sadd.s32 4294967295, %s1280_s20   ;;  %s1280_s20 = sphi %s1352_s20, %s27_s20   ;;  %s1276_s19 = sphi %s1350_s19, %s1609_s19   ;;  %s1272_s18 = sphi %s1348_s18, %s1608_s18   ;;  %s1268_s17 = sphi %s1346_s17, %s1607_s17   ;;  %s1264_s16 = sphi %s1344_s16, %s1606_s16   ;;  %s1260_s15 = sphi %s1342_s15, %s1605_s15   ;;  %s1256_s14 = sphi %s1340_s14, %s1611_s14   ;;  %s1252_s13 = sphi %s1338_s13, %s1610_s13  }
   0xa   : > { %1596 = sst [smem:[#allocation10_spill]] %s1272_s18  ;;  %s902_s22 = sadd.s32 4294967294, %s1280_s20  }
   0xb   : > { %1597 = sst [smem:[#allocation11_spill]] %s1276_s19  ;;  %s36_s23 = sadd.s32 1, %s1272_s18 }
   0xc   : > { %p37_p0 = scmp.ge.s32.totalorder %s36_s23, 4  ;;  %s39_s24 = sadd.s32 1, %s1276_s19 }
   0xd   : > { %p252_p1 = scmp.ne.s32.totalorder %s1260_s15, %s1256_s14  ;;  %p253_p2 = scmp.eq.s32.totalorder %s901_s21, 7 }
   0xe   : > { %s1613_s23 = smov (%p37_p0, %s36_s23), 0  ;;  %s1615_s24 = smov (!%p37_p0, %s39_s24), %s1276_s19 }
   0xf   : > { %1598 = sst [smem:[#allocation12_spill]] %s1613_s23  ;;  %p1387_p3 = por %p253_p2, %p252_p1 }
  0x10   : > { %p258_p4 = scmp.ne.s32.totalorder %s1256_s14, %s1252_s13  ;;  %p41_p5 = scmp.ge.s32.totalorder %s1615_s24, 2 }
  0x11   : > { %p259_p6 = scmp.eq.s32.totalorder %s902_s22, 7  ;;  %p905_p7 = scmp.ge.s32.totalorder %s1280_s20, 1 }
  0x12   : > { %p340_p8 = scmp.lt.s32.totalorder %s1280_s20, 9  ;;  %s1617_s24 = smov (%p41_p5, %s1615_s24), 0 }
  0x13   : > { %1600 = sst [smem:[#allocation13_spill]] %s1617_s24  ;;  %p1397_p9 = por %p259_p6, %p258_p4 }
  0x14   : > { %p341_p10 = pnand %p905_p7, %p340_p8  ;;  %s239_s27 = ssub.s32 %s1276_s19, %s1617_s24 }
  0x15   : > { %s242_s28 = sadd.s32 1, %s1260_s15  ;;  %p240_p11 = scmp.eq.s32.totalorder %s239_s27, 0 }
  0x16   : > { %344 = sbr.rel (%p341_p10) target bundleno = 686 (0x2ae), region = 56  ;;  %s1408_s30 = sand.u32 (!%p341_p10), 1, %s1256_s14  }
  0x17   : > { %s1405_s29 = scalar_select %p240_p11, %s1260_s15, %s242_s28  }
  0x18   : > { %s906_s11 = sshll.u32 (!%p341_p10), %s1264_s16, 3  ;;  %p386_p12 = scmp.lt.s32.totalorder (!%p341_p10), %s1268_s17, 1 }
  0x19   : > { %1602 = sst [smem:[#allocation14_spill]] %s1405_s29  ;;  %p388_p13 = scmp.lt.s32.totalorder (!%p341_p10), %s906_s11, 31 }
  0x1a   : > { %s1603_s0 = sld [smem:[#allocation15_spill]] (!%p341_p10)  ;;  %s378_s19 = scalar_lea.vmem (!%p341_p10), [#allocation3], %s1408_s30 }
  0x1b   : > { %s387_s12 = scalar_select %p386_p12, %s1268_s17, 1 }
  0x1c   : > { %s1619_s11 = smov (!%p388_p13, %s906_s11), 31  ;;  %s384_s18 = scalar_lea.vmem [#allocation5], %s1408_s30 }
  0x1d   : > { %s907_s21 = sshll.u32 %s387_s12, 5  ;;  %p909_p0 = scmp.ne.s32.totalorder %s1264_s16, 0 }
  0x1e   : > { %s391_s22 = sadd.s32 %s907_s21, %s1619_s11 }
  0x1f   : > { %s908_s24 = sshll.u32 %s391_s22, 2  ;;  %399 = sbr.rel (%p909_p0) target bundleno = 38 (0x26), region = 60 }
  0x20   : > { %s393_s23 = scalar_lea.vmem %s1603_s0, %s908_s24 }
  0x24   : > { %v1282_v0 = vmov 0.0  }
  0x25   : > { %400 = vst [vmem:[#allocation2] sm:$0x1] %v1282_v0 }
  0x26 PF: > { %v413_v1 = vld [vmem:[%s1580_s1 + $0x10] sm:$0x3]  ;;  %vm466_vm0 = vcmask 1041408   ;;  %v1042_v5 = vld [vmem:[%s1580_s1 + $0x8] sm:$0xff]  ;;  %v1041_v6 = vld [vmem:[%s1580_s1] sm:$0xff]  ;;  %vm453_vm1 = vcmask 293888  }
  0x27   : > { %v447_v2 = vunpack.c.l.b16 %v413_v1  ;;  %v1037_v7 = vld [vmem:[%s393_s23] sm:$0xff]  ;;  %v1038_v8 = vld [vmem:[%s393_s23 + $0x8] sm:$0xff]  ;;  %v1039_v9 = vld [vmem:[%s393_s23 + $0x10] sm:$0xff]  ;;  %p938_p1 = scmp.ne.s32.totalorder %s1264_s16, 3 }
  0x28   : > { %v1040_v10 = vld [vmem:[%s393_s23 + $0x18] sm:$0xff]  ;;  %v1153_v13 = vld [vmem:[%s1581_s2] ss:$0 sm:$0xff] }
  0x29   : > { %v450_v3 = vpack.c.b16 %v447_v2, %v447_v2 }
  0x2b   : > { %v468_v4 = vsel %vm466_vm0, %v450_v3, 0 }
  0x2c   : > { %475 = vmatpush.bf16.msra.mxu0 %v468_v4  ;;  %1067 = vmatpush.bf16.msra.mxu1 %v468_v4  ;;  %v507_v48 = vld [vmem:[#allocation2] sm:$0x1] }
  0x2d   : > { %1068 = vmatpush.bf16.msra.mxu2 %v468_v4  ;;  %1069 = vmatpush.bf16.msra.mxu3 %v468_v4 }
  0x30   : > { %476 = vmatpush.bf16.msra.mxu0 %v1042_v5  ;;  %1070 = vmatpush.bf16.msra.mxu1 %v1042_v5 }
  0x31   : > { %1071 = vmatpush.bf16.msra.mxu2 %v1042_v5  ;;  %1072 = vmatpush.bf16.msra.mxu3 %v1042_v5 }
  0x34   : > { %477 = vmatpush.bf16.msra.mxu0 %v1041_v6  ;;  %1073 = vmatpush.bf16.msra.mxu1 %v1041_v6 }
  0x35   : > { %1074 = vmatpush.bf16.msra.mxu2 %v1041_v6  ;;  %1075 = vmatpush.bf16.msra.mxu3 %v1041_v6 }
  0x37   : > { %934 = vmatmul.msk.bf16.vlgmr.msra.gmra.mxu0 %vm453_vm1, %v1037_v7  ;;  %935 = vmatmul.msk.bf16.vlgmr.msra.gmra.mxu1 %vm453_vm1, %v1038_v8 }
  0x38   : > { %936 = vmatmul.msk.bf16.vlgmr.msra.gmra.mxu2 %vm453_vm1, %v1039_v9  ;;  %937 = vmatmul.msk.bf16.vlgmr.msra.gmra.mxu3 %vm453_vm1, %v1040_v10 }
  0xb4   : > { %v479_v11 = vpop.f32.mrf.mxu0  ;;  %v484_v12 = vpop.f32.mrf.mxu1 }
  0xb5   : > { %v480_v14 = vadd.f32 %v1153_v13, %v479_v11  ;;  %v485_v19 = vadd.f32 %v1153_v13, %v484_v12 }
  0xb7   : > { %v499_v21 = vmax.f32 %v480_v14, 0.0  ;;  %v501_v24 = vmax.f32 %v485_v19, 0.0 }
  0xbb   : > { %v489_v15 = vpop.f32.mrf.mxu2  ;;  %v494_v16 = vpop.f32.mrf.mxu3 }
  0xbc   : > { %v481_v17 = vpop.f32.mrf.mxu0  ;;  %v486_v18 = vpop.f32.mrf.mxu1  ;;  %v490_v25 = vadd.f32 %v1153_v13, %v489_v15  ;;  %v495_v33 = vadd.f32 %v1153_v13, %v494_v16 }
  0xbd   : > { %v482_v20 = vadd.f32 %v1153_v13, %v481_v17  ;;  %v487_v23 = vadd.f32 %v1153_v13, %v486_v18 }
  0xbe   : > { %v503_v32 = vmax.f32 %v490_v25, 0.0  ;;  %v505_v38 = vmax.f32 %v495_v33, 0.0 }
  0xbf   : > { %v500_v22 = vmax.f32 %v482_v20, 0.0  ;;  %v502_v27 = vmax.f32 %v487_v23, 0.0 }
  0xc1   : > { %v508_v26 = vadd.f32 %v500_v22, %v499_v21 }
  0xc3   : > { %v509_v28 = vadd.f32 %v508_v26, %v501_v24  ;;  %v491_v29 = vpop.f32.mrf.mxu2  ;;  %v496_v31 = vpop.f32.mrf.mxu3 }
  0xc4   : > { %v492_v30 = vadd.f32 %v1153_v13, %v491_v29  ;;  %v497_v37 = vadd.f32 %v1153_v13, %v496_v31 }
  0xc5   : > { %v510_v34 = vadd.f32 %v509_v28, %v502_v27 }
  0xc6   : > { %v504_v35 = vmax.f32 %v492_v30, 0.0  ;;  %v506_v40 = vmax.f32 %v497_v37, 0.0 }
  0xc7   : > { %v511_v36 = vadd.f32 %v510_v34, %v503_v32 }
  0xc9   : > { %v512_v39 = vadd.f32 %v511_v36, %v504_v35 }
  0xcb   : > { %v513_v41 = vadd.f32 %v512_v39, %v505_v38 }
  0xcd   : > { %v514_v42 = vadd.f32 %v513_v41, %v506_v40 }
  0xcf   : > { %v515_v43 = vrot.slane %v514_v42, 4 }
  0xd1   : > { %v516_v44 = vadd.f32 %v515_v43, %v514_v42 }
  0xd3   : > { %v517_v45 = vrot.slane %v516_v44, 2 }
  0xd5   : > { %v518_v46 = vadd.f32 %v517_v45, %v516_v44 }
  0xd7   : > { %v519_v47 = vrot.slane %v518_v46, 1 }
  0xd9   : > { %v520_v49 = vadd.f32 %v519_v47, %v518_v46  ;;  %526 = sbr.rel (%p938_p1) target bundleno = 658 (0x292), region = 64 }
  0xdb   : > { %v521_v50 = vadd.f32 %v520_v49, %v507_v48 }
  0xdd   : > { %522 = vst [vmem:[#allocation2] sm:$0x1] %v521_v50 }
  0xde   : > { %v1050_v51 = vld [vmem:[%s1582_s3 + $0x38] sm:$0xff]  ;;  %v1049_v52 = vld [vmem:[%s1582_s3 + $0x30] sm:$0xff]  ;;  %v1048_v55 = vld [vmem:[%s1582_s3 + $0x28] sm:$0xff] }
  0xdf   : > { %595 = vmatpush.bf16.msra.mxu0 %v1050_v51  ;;  %v1058_v53 = vld [vmem:[%s1584_s5 + $0x38] sm:$0xff]  ;;  %v1057_v54 = vld [vmem:[%s1584_s5 + $0x30] sm:$0xff]  ;;  %v1056_v56 = vld [vmem:[%s1584_s5 + $0x28] sm:$0xff] }
  0xe0   : > { %674 = vmatpush.bf16.msra.mxu1 %v1058_v53  ;;  %v1047_v57 = vld [vmem:[%s1582_s3 + $0x20] sm:$0xff]  ;;  %v1046_v59 = vld [vmem:[%s1582_s3 + $0x18] sm:$0xff]  ;;  %v1045_v61 = vld [vmem:[%s1582_s3 + $0x10] sm:$0xff] }
  0xe1   : > { %v1055_v58 = vld [vmem:[%s1584_s5 + $0x20] sm:$0xff]  ;;  %v1054_v60 = vld [vmem:[%s1584_s5 + $0x18] sm:$0xff]  ;;  %v1053_v62 = vld [vmem:[%s1584_s5 + $0x10] sm:$0xff] }
  0xe2   : > { %v1044_v63 = vld [vmem:[%s1582_s3 + $0x8] sm:$0xff]  ;;  %v1043_v2 = vld [vmem:[%s1582_s3] sm:$0xff]  ;;  %v1066_v6 = vld [vmem:[%s1586_s7 + $0x38] sm:$0xff] }
  0xe3   : > { %596 = vmatpush.bf16.msra.mxu0 %v1049_v52  ;;  %v1052_v4 = vld [vmem:[%s1584_s5 + $0x8] sm:$0xff]  ;;  %v1051_v5 = vld [vmem:[%s1584_s5] sm:$0xff]  ;;  %756 = vmatpush.bf16.msra.mxu2 %v1066_v6  ;;  %v1065_v7 = vld [vmem:[%s1586_s7 + $0x30] sm:$0xff] }
  0xe4   : > { %675 = vmatpush.bf16.msra.mxu1 %v1057_v54  ;;  %v527_v0 = vld [vmem:[#allocation2] sm:$0x1]  ;;  %v1064_v8 = vld [vmem:[%s1586_s7 + $0x28] sm:$0xff]  ;;  %v1062_v10 = vld [vmem:[%s1586_s7 + $0x18] sm:$0xff] }
  0xe5   : > { %v528_v1 = vmul.f32 0.00390625, %v527_v0  ;;  %v1063_v9 = vld [vmem:[%s1586_s7 + $0x20] sm:$0xff]  ;;  %v1061_v11 = vld [vmem:[%s1586_s7 + $0x10] sm:$0xff]  ;;  %v1060_v18 = vld [vmem:[%s1586_s7 + $0x8] sm:$0xff] }
  0xe6   : > { %v546_v12 = vld [vmem:[%s1583_s4] sm:$0x1] }
  0xe7   : > { %597 = vmatpush.bf16.msra.mxu0 %v1048_v55  ;;  %v529_v3 = vpack.c.bf16 %v528_v1, %v528_v1  ;;  %757 = vmatpush.bf16.msra.mxu2 %v1065_v7  ;;  %v1059_v19 = vld [vmem:[%s1586_s7] sm:$0xff] }
  0xe8   : > { %676 = vmatpush.bf16.msra.mxu1 %v1056_v56  ;;  %v688_v21 = vld [vmem:[%s1585_s6] sm:$0x1] }
  0xe9   : > { %v707_v26 = vld [vmem:[%s1587_s8] sm:$0x1] }
  0xeb   : > { %598 = vmatpush.bf16.msra.mxu0 %v1047_v57  ;;  %758 = vmatpush.bf16.msra.mxu2 %v1064_v8 }
  0xec   : > { %677 = vmatpush.bf16.msra.mxu1 %v1055_v58 }
  0xef   : > { %599 = vmatpush.bf16.msra.mxu0 %v1046_v59  ;;  %759 = vmatpush.bf16.msra.mxu2 %v1063_v9 }
  0xf0   : > { %678 = vmatpush.bf16.msra.mxu1 %v1054_v60 }
  0xf3   : > { %600 = vmatpush.bf16.msra.mxu0 %v1045_v61  ;;  %760 = vmatpush.bf16.msra.mxu2 %v1062_v10 }
  0xf4   : > { %679 = vmatpush.bf16.msra.mxu1 %v1053_v62 }
  0xf7   : > { %601 = vmatpush.bf16.msra.mxu0 %v1044_v63  ;;  %761 = vmatpush.bf16.msra.mxu2 %v1061_v11 }
  0xf8   : > { %680 = vmatpush.bf16.msra.mxu1 %v1052_v4 }
  0xfb   : > { %602 = vmatpush.bf16.msra.mxu0 %v1043_v2  ;;  %762 = vmatpush.bf16.msra.mxu2 %v1060_v18 }
  0xfc   : > { %681 = vmatpush.bf16.msra.mxu1 %v1051_v5 }
  0xfe   : > { %603 = vmatmul.bf16.vlgmr.msra.gmra.mxu0 %v529_v3 }
  0xff   : > { %763 = vmatpush.bf16.msra.mxu2 %v1059_v19 }
 0x17b   : > { %v604_v13 = vpop.f32.mrf.mxu0 }
 0x17c   : > { %v605_v14 = vadd.f32 %v604_v13, %v546_v12 }
 0x17e   : > { %v608_v15 = vmax.f32 %v605_v14, 0.0 }
 0x180   : > { %v609_v16 = vpack.c.bf16 %v608_v15, %v608_v15 }
 0x182   : > { %682 = vmatmul.bf16.vlgmr.msra.gmra.mxu1 %v609_v16 }
 0x183   : > { %v606_v17 = vpop.f32.mrf.mxu0 }
 0x1ff   : > { %v683_v20 = vpop.f32.mrf.mxu1 }
 0x200   : > { %v687_v22 = vadd.f32 %v683_v20, %v528_v1 }
 0x202   : > { %v689_v23 = vadd.f32 %v688_v21, %v687_v22 }
 0x204   : > { %769 = vst [vmem:[%s384_s18] sm:$0x1] %v689_v23  ;;  %v690_v24 = vpack.c.bf16 %v689_v23, %v689_v23 }
 0x206   : > { %764 = vmatmul.bf16.vlgmr.msra.gmra.mxu2 %v690_v24 }
 0x207   : > { %v685_v25 = vpop.f32.mrf.mxu1 }
 0x289   : > { %v765_v27 = vpop.f32.mrf.mxu2 }
 0x28a   : > { %v766_v28 = vadd.f32 %v765_v27, %v707_v26 }
 0x28c   : > { %770 = vst [vmem:[%s378_s19] sm:$0x1] %v766_v28 }
 0x291   : > { %v767_v29 = vpop.f32.mrf.mxu2 }
 0x292 PF: > { %s784_s22 = scalar_lea.hbm %s1588_s9, %s1268_s17  ;;  %s786_s27 = sshll.u32 %s378_s19, 4  ;;  %s787_s27 = int_to_ptr.vmem [resolvable:$true] %s786_s27 }
 0x293   : > { %s788_s28 = sshll.u32 %s784_s22, 4  ;;  %s772_s11 = scalar_lea.sflag [#allocation4], %s1408_s30  ;;  %s789_s28 = int_to_ptr.hbm [resolvable:$true] %s788_s28 }
 0x294   : > { %s1168_s24 = sshra.s32 %s789_s28, 4  ;;  %s1174_s15 = scalar_lea.hbm %s1588_s9, 2  ;;  %s1169_s24 = int_to_ptr.hbm [resolvable:$true] %s1168_s24 }
 0x295   : > { %s1170_s12 = scalar_lea.hbm %s1169_s24, 1  ;;  %p1175_p6 = scmp.lt.s32.totalorder %s1169_s24, %s1588_s9 }
 0x296   : > { %p1171_p2 = scmp.ne.s32.totalorder %s1169_s24, %s1170_s12  ;;  %p1176_p7 = scmp.lt.s32.totalorder %s1174_s15, %s1170_s12 }
 0x298   : > { %p1172_p4 = pnand %p1171_p2, %p1387_p3  ;;  %p1177_p8 = por %p1176_p7, %p1175_p6 }
 0x29a   : > { %p1173_p5 = pneg %p1172_p4 }
 0x29c   : > { %p1178_p10 = pnand %p1177_p8, %p1173_p5 }
 0x29e   : > { %1181 = shalt.err (!%p1178_p10)
}
 0x29f   : > { %1076 = dma.vmem_to_hbm [thread:$0]  (%p1387_p3), %s787_s27, 16, %s789_s28, %s772_s11  }
 0x2a0   : > { %s797_s21 = scalar_lea.hbm %s1589_s10, %s1268_s17  ;;  %s799_s16 = sshll.u32 %s384_s18, 4  ;;  %s800_s16 = int_to_ptr.vmem [resolvable:$true] %s799_s16 }
 0x2a1   : > { %s801_s0 = sshll.u32 %s797_s21, 4  ;;  %s776_s24 = scalar_lea.sflag [#allocation6], %s1408_s30  ;;  %s802_s0 = int_to_ptr.hbm [resolvable:$true] %s801_s0 }
 0x2a2   : > { %s1196_s12 = sshra.s32 %s802_s0, 4  ;;  %s1202_s27 = scalar_lea.hbm %s1589_s10, 2  ;;  %s1197_s12 = int_to_ptr.hbm [resolvable:$true] %s1196_s12 }
 0x2a3   : > { %s1198_s15 = scalar_lea.hbm %s1197_s12, 1  ;;  %p1203_p0 = scmp.lt.s32.totalorder %s1197_s12, %s1589_s10 }
 0x2a4   : > { %p1199_p11 = scmp.ne.s32.totalorder %s1197_s12, %s1198_s15  ;;  %p1204_p1 = scmp.lt.s32.totalorder %s1202_s27, %s1198_s15 }
 0x2a6   : > { %p1200_p12 = pnand %p1199_p11, %p1387_p3  ;;  %p1205_p2 = por %p1204_p1, %p1203_p0 }
 0x2a8   : > { %p1201_p13 = pneg %p1200_p12 }
 0x2aa   : > { %p1206_p4 = pnand %p1205_p2, %p1201_p13 }
 0x2ac   : > { %1209 = shalt.err (!%p1206_p4)
}
 0x2ad   : > { %1077 = dma.vmem_to_hbm [thread:$0]  (%p1387_p3), %s800_s16, 16, %s802_s0, %s776_s24  }
 0x2ae PF: > { %p1087_p5 = scmp.ge.s32.totalorder %s1280_s20, 2  ;;  %s813_s17 = sand.u32 1, %s1252_s13  }
 0x2af   : > { %s814_s18 = scalar_lea.sflag [#allocation4], %s813_s17 }
 0x2b0   : > { %p1081_p6 = pnand %p1087_p5, %p1397_p9 }
 0x2b2   : > { %p1082_p7 = pneg %p1081_p6 }
 0x2b4   : > { %1243 = dma.done.wait (%p1082_p7), %s814_s18, 16  }
 0x2b5   : > { %1245 = vsyncadd (%p1082_p7), %s814_s18, 4294967280  ;;  %s823_s30 = scalar_lea.sflag [#allocation6], %s813_s17 }
 0x2b6   : > { %1247 = dma.done.wait (%p1082_p7), %s823_s30, 16  }
 0x2b7   : > { %1249 = vsyncadd (%p1082_p7), %s823_s30, 4294967280  ;;  %s27_s20 = sadd.s32 1, %s1280_s20   ;;  %s1604_s0 = sld [smem:[#allocation9_spill]] }
 0x2b8   : > { %p24_p8 = scmp.ge.s32.totalorder %s27_s20, 10   ;;  %s1605_s15 = sld [smem:[#allocation14_spill]] }
 0x2b9   : > { %s1606_s16 = sld [smem:[#allocation10_spill]]  ;;  %s1610_s13 = smov %s1256_s14 }
 0x2ba   : > { %s1607_s17 = sld [smem:[#allocation11_spill]]  ;;  %26 = sbr.rel (!%p24_p8) target bundleno = 9 (0x9), region = 116 }
 0x2bb   : > { %s1608_s18 = sld [smem:[#allocation12_spill]] }
 0x2bc   : > { %s1609_s19 = sld [smem:[#allocation13_spill]] }
 0x2bd   : > { %s1611_s14 = smov %s1604_s0 }
 0x2bf   :  { %828 = vsyncpa [#allocation4], 1 }
 0x2c0   :  { %830 = vsyncpa [#allocation4 + $0x1], 1 }
 0x2c1   :  { %831 = vsyncpa [#allocation6], 1 }
 0x2c2   :  { %833 = vsyncpa [#allocation6 + $0x1], 1 }

</bundles_post_ra>
